<compile_context>
chip_gen: v5e
topology: v5e:2x2
jax: 0.10.0
libtpu: 0.0.40
codegen_flags: <defaults>
</compile_context>

<pallas_src>
import jax
import jax.numpy as jnp
from jax import lax
from jax.experimental import pallas as pl
from jax.experimental.pallas import tpu as pltpu

# Small, fixed model dimensions (consistent with a tiny TFLite classifier).
N, H, W, CIN = 2, 16, 16, 4
COUT = 8
KH = KW = 3
NUM_CLASSES = 16
NUM_CLASSES_PAD = 128          # lane-dense padded class axis
HW = H * W                     # 256 -> two full vregs worth of lanes
KSIZE = KH * KW * CIN          # 36


def tflite_kernel(p_ref, wct_ref, bc_ref, wd_ref, bd_ref, o_ref):
    """Whole batch in a single invocation.

    p_ref  : (KSIZE, N*HW)           im2col patches, spatial on lanes
    wct_ref: (COUT, KSIZE)           flattened + transposed conv weights
    bc_ref : (COUT, 1)               conv bias (broadcast along lanes)
    wd_ref : (COUT, NUM_CLASSES_PAD) dense weights, class axis padded to 128
    bd_ref : (1, NUM_CLASSES_PAD)    dense bias, padded lanes = -1e30
    o_ref  : (N, NUM_CLASSES_PAD)    softmax probabilities (padded lanes ~ 0)
    """
    # Conv2D 3x3 SAME as ONE MXU matmul over im2col patches -> (COUT, N*HW).
    y = jnp.dot(wct_ref[...], p_ref[...], preferred_element_type=jnp.float32)
    y = jnp.clip(y + bc_ref[...], 0.0, 6.0)            # bias + ReLU6

    # Global average pool for both images at once: canonical trans-B
    # contraction pool_mat (N, N*HW) . y^T -> pooled lands as (N, COUT).
    col = lax.broadcasted_iota(jnp.int32, (N, N * HW), 1)
    img = lax.broadcasted_iota(jnp.int32, (N, N * HW), 0)
    in_img = (col >= img * HW) & (col < (img + 1) * HW)
    pool_mat = jnp.where(in_img, 1.0 / HW, 0.0).astype(jnp.float32)
    pooled = lax.dot_general(pool_mat, y, (((1,), (1,)), ((), ())),
                             preferred_element_type=jnp.float32)   # (N, COUT)

    # Fully connected + bias on the lane-dense (padded-to-128) class axis.
    logits = jnp.dot(pooled, wd_ref[...],
                     preferred_element_type=jnp.float32) + bd_ref[...]

    # Softmax along lanes; padded lanes carry -1e30 bias so exp underflows to
    # 0 and they drop out of the normalization.
    m = jnp.max(logits, axis=-1, keepdims=True)
    e = jnp.exp(logits - m)
    o_ref[...] = e / jnp.sum(e, axis=-1, keepdims=True)


def tflite_forward(x_nchw, wc, bc, wd, bd):
    """NCHW input (PyTorch convention) -> class probabilities (N, NUM_CLASSES)."""
    x = x_nchw.astype(jnp.float32)
    xp = jnp.pad(x, ((0, 0), (0, 0), (1, 1), (1, 1)))        # SAME pad, NCHW

    # im2col with spatial on the last (lane) axis; row order (kh, kw, cin)
    # matches the HWIO weight flattening below.
    taps = []
    for kh in range(KH):
        for kw in range(KW):
            taps.append(xp[:, :, kh:kh + H, kw:kw + W])      # (N, CIN, H, W)
    patches = jnp.stack(taps, axis=0)                        # (9, N, CIN, H, W)
    patches = patches.transpose(0, 2, 1, 3, 4).reshape(KSIZE, N * HW)

    wct = wc.reshape(KSIZE, COUT).T                          # (COUT, KSIZE)
    bc_col = bc.reshape(COUT, 1)
    wd_pad = jnp.pad(wd, ((0, 0), (0, NUM_CLASSES_PAD - NUM_CLASSES)))
    bd_pad = jnp.pad(bd.reshape(1, NUM_CLASSES),
                     ((0, 0), (0, NUM_CLASSES_PAD - NUM_CLASSES)),
                     constant_values=-1e30)

    # TODO(synk): allow_input_fusion could also fold the pad/im2col producers
    # into the custom call; left at defaults to keep compilation conservative.
    out_pad = pl.pallas_call(
        tflite_kernel,
        out_shape=jax.ShapeDtypeStruct((N, NUM_CLASSES_PAD), jnp.float32),
        in_specs=[pl.BlockSpec(memory_space=pltpu.MemorySpace.VMEM)] * 5,
        out_specs=pl.BlockSpec(memory_space=pltpu.MemorySpace.VMEM),
    )(patches, wct, bc_col, wd_pad, bd_pad)

    return out_pad[:, :NUM_CLASSES]


def reference(x_nchw, wc, bc, wd, bd):
    """Pure-JAX reference of the same synthetic graph (correctness check)."""
    x = jnp.transpose(x_nchw, (0, 2, 3, 1)).astype(jnp.float32)
    y = lax.conv_general_dilated(
        x, wc, window_strides=(1, 1), padding="SAME",
        dimension_numbers=("NHWC", "HWIO", "NHWC"))
    y = jnp.clip(y + bc.reshape(1, 1, 1, COUT), 0.0, 6.0)
    pooled = jnp.mean(y, axis=(1, 2))
    logits = pooled @ wd + bd.reshape(1, NUM_CLASSES)
    return jax.nn.softmax(logits, axis=-1)


if __name__ == "__main__":
    key = jax.random.PRNGKey(0)
    k_x, k_wc, k_bc, k_wd, k_bd = jax.random.split(key, 5)

    # Deterministic synthetic "checkpoint" (shapes fixed by the synthetic graph).
    x = jax.random.normal(k_x, (N, CIN, H, W), dtype=jnp.float32)       # NCHW in
    wc = jax.random.normal(k_wc, (KH, KW, CIN, COUT), jnp.float32) * 0.2
    bc = jax.random.normal(k_bc, (1, COUT), jnp.float32) * 0.1
    wd = jax.random.normal(k_wd, (COUT, NUM_CLASSES), jnp.float32) * 0.2
    bd = jax.random.normal(k_bd, (1, NUM_CLASSES), jnp.float32) * 0.1

    out = jax.block_until_ready(tflite_forward(x, wc, bc, wd, bd))
    ref = jax.block_until_ready(reference(x, wc, bc, wd, bd))

    assert out.shape == (N, NUM_CLASSES)
    assert jnp.allclose(out, ref, atol=1e-5, rtol=1e-5), "mismatch vs reference"

    print("KERNEL_OK")
</pallas_src>

<mosaic_0001>
module attributes {stable_mosaic.version = 11 : i64} {
  func.func @tflite_kernel(%arg0: memref<36x512xf32, #tpu.memory_space<vmem>>, %arg1: memref<8x36xf32, #tpu.memory_space<vmem>>, %arg2: memref<8x1xf32, #tpu.memory_space<vmem>>, %arg3: memref<8x128xf32, #tpu.memory_space<vmem>>, %arg4: memref<1x128xf32, #tpu.memory_space<vmem>>, %arg5: memref<2x128xf32, #tpu.memory_space<vmem>>) attributes {dimension_semantics = [], scalar_prefetch = 0 : i64, scratch_operands = 0 : i64, tpu.core_type = #tpu.core_type<tc>} {
    %c0 = arith.constant 0 : index
    %c0_0 = arith.constant 0 : index
    %0 = vector.load %arg1[%c0, %c0_0] : memref<8x36xf32, #tpu.memory_space<vmem>>, vector<8x36xf32>
    %c0_1 = arith.constant 0 : index
    %c0_2 = arith.constant 0 : index
    %1 = vector.load %arg0[%c0_1, %c0_2] : memref<36x512xf32, #tpu.memory_space<vmem>>, vector<36x512xf32>
    %cst = arith.constant dense<0.000000e+00> : vector<8x512xf32>
    %2 = tpu.matmul %0, %1, %cst {dimension_numbers = #tpu.dot_dimension_numbers<[1], [0], [0], [1], [0, 0, 1, 1], [], []>} : vector<8x36xf32>, vector<36x512xf32>, vector<8x512xf32> -> vector<8x512xf32>
    %c0_3 = arith.constant 0 : index
    %c0_4 = arith.constant 0 : index
    %3 = vector.load %arg2[%c0_3, %c0_4] : memref<8x1xf32, #tpu.memory_space<vmem>>, vector<8x1xf32>
    %4 = vector.broadcast %3 : vector<8x1xf32> to vector<8x512xf32>
    %5 = arith.addf %2, %4 : vector<8x512xf32>
    %cst_5 = arith.constant 0.000000e+00 : f32
    %cst_6 = arith.constant 6.000000e+00 : f32
    %6 = vector.broadcast %cst_5 : f32 to vector<8x512xf32>
    %7 = arith.maximumf %6, %5 : vector<8x512xf32>
    %8 = vector.broadcast %cst_6 : f32 to vector<8x512xf32>
    %9 = arith.minimumf %8, %7 : vector<8x512xf32>
    %10 = tpu.iota {dimensions = array<i32: 1>} : vector<2x512xi32>
    %11 = tpu.iota {dimensions = array<i32: 0>} : vector<2x512xi32>
    %c256_i32 = arith.constant 256 : i32
    %12 = vector.broadcast %c256_i32 : i32 to vector<2x512xi32>
    %13 = arith.muli %11, %12 : vector<2x512xi32>
    %14 = arith.cmpi sge, %10, %13 : vector<2x512xi32>
    %c1_i32 = arith.constant 1 : i32
    %15 = vector.broadcast %c1_i32 : i32 to vector<2x512xi32>
    %16 = arith.addi %11, %15 : vector<2x512xi32>
    %c256_i32_7 = arith.constant 256 : i32
    %17 = vector.broadcast %c256_i32_7 : i32 to vector<2x512xi32>
    %18 = arith.muli %16, %17 : vector<2x512xi32>
    %19 = arith.cmpi slt, %10, %18 : vector<2x512xi32>
    %20 = arith.andi %14, %19 : vector<2x512xi1>
    %cst_8 = arith.constant 3.906250e-03 : f32
    %cst_9 = arith.constant 0.000000e+00 : f32
    %21 = vector.broadcast %cst_8 : f32 to vector<2x512xf32>
    %22 = vector.broadcast %cst_9 : f32 to vector<2x512xf32>
    %23 = arith.select %20, %21, %22 : vector<2x512xi1>, vector<2x512xf32>
    %cst_10 = arith.constant dense<0.000000e+00> : vector<2x8xf32>
    %24 = tpu.matmul %23, %9, %cst_10 {dimension_numbers = #tpu.dot_dimension_numbers<[1], [1], [0], [0], [0, 0, 1, 0], [], []>} : vector<2x512xf32>, vector<8x512xf32>, vector<2x8xf32> -> vector<2x8xf32>
    %c0_11 = arith.constant 0 : index
    %c0_12 = arith.constant 0 : index
    %25 = vector.load %arg3[%c0_11, %c0_12] : memref<8x128xf32, #tpu.memory_space<vmem>>, vector<8x128xf32>
    %cst_13 = arith.constant dense<0.000000e+00> : vector<2x128xf32>
    %26 = tpu.matmul %24, %25, %cst_13 {dimension_numbers = #tpu.dot_dimension_numbers<[1], [0], [0], [1], [0, 0, 1, 1], [], []>} : vector<2x8xf32>, vector<8x128xf32>, vector<2x128xf32> -> vector<2x128xf32>
    %c0_14 = arith.constant 0 : index
    %c0_15 = arith.constant 0 : index
    %27 = vector.load %arg4[%c0_14, %c0_15] : memref<1x128xf32, #tpu.memory_space<vmem>>, vector<1x128xf32>
    %28 = vector.broadcast %27 : vector<1x128xf32> to vector<2x128xf32>
    %29 = arith.addf %26, %28 : vector<2x128xf32>
    %cst_16 = arith.constant dense<0xFF800000> : vector<2xf32>
    %30 = vector.multi_reduction <maximumf>, %29, %cst_16 [1] : vector<2x128xf32> to vector<2xf32>
    %31 = vector.shape_cast %30 : vector<2xf32> to vector<2x1xf32>
    %32 = vector.broadcast %31 : vector<2x1xf32> to vector<2x128xf32>
    %33 = arith.subf %29, %32 : vector<2x128xf32>
    %34 = math.exp %33 : vector<2x128xf32>
    %cst_17 = arith.constant dense<0.000000e+00> : vector<2xf32>
    %35 = vector.multi_reduction <add>, %34, %cst_17 [1] : vector<2x128xf32> to vector<2xf32>
    %36 = vector.shape_cast %35 : vector<2xf32> to vector<2x1xf32>
    %37 = vector.broadcast %36 : vector<2x1xf32> to vector<2x128xf32>
    %38 = arith.divf %34, %37 : vector<2x128xf32>
    %c0_18 = arith.constant 0 : index
    %c0_19 = arith.constant 0 : index
    %39 = vector.load %arg5[%c0_18, %c0_19] : memref<2x128xf32, #tpu.memory_space<vmem>>, vector<2x128xf32>
    tpu.vector_store %arg5[%c0_18, %c0_19], %38 {strides = array<i32>} : memref<2x128xf32, #tpu.memory_space<vmem>>, vector<2x128xf32>,
    return
  }
}

</mosaic_0001>

<bundles_post_ra>
// kernel: tpu_custom_call.1
= control target key start
LH: loop header
LB: loop body
LE: loop exit
PB: predicated region body
PF: predicated region fallthrough
CT: control target
= control target key end

     0   :  { %10 = vsyncpa [#allocation3], 0  ;;  %s533_s0 = inlined_call_operand.hbm [shape: f32[36,512], index: 0, kind: input, shape index: {}]   ;;  %s534_s1 = inlined_call_operand.vmem [shape: f32[8,36], index: 1, kind: input, shape index: {}]   ;;  %s535_s2 = inlined_call_operand.vmem [shape: f32[8,1], index: 2, kind: input, shape index: {}]   ;;  %s536_s3 = inlined_call_operand.hbm [shape: f32[8,128], index: 3, kind: input, shape index: {}]   ;;  %s537_s4 = inlined_call_operand.vmem [shape: f32[1,128], index: 4, kind: input, shape index: {}]   ;;  %s538_s5 = inlined_call_operand.hbm [shape: f32[2,128], index: 5, kind: output, shape index: {}]  }
   0x1   :  { %11 = vsyncpa [#allocation6], 0 }
   0x2   :  { %12 = vsyncpa [#allocation4], 0  ;;  %s17_s20 = sshll.u32 %s533_s0, 4  ;;  %s466_s21 = smov [#allocation2]   ;;  %s18_s20 = int_to_ptr.hbm [resolvable:$true] %s17_s20 }
   0x3   :  { %s19_s22 = sshll.u32 %s466_s21, 4  ;;  %s35_s25 = sshll.u32 %s536_s3, 4  ;;  %s20_s22 = int_to_ptr.vmem [resolvable:$true] %s19_s22  ;;  %s36_s25 = int_to_ptr.hbm [resolvable:$true] %s35_s25 }
   0x4   :  { %s467_s26 = smov 512   ;;  %s468_s27 = smov 32  }
   0x5   :  { %25 = dma.hbm_to_vmem [thread:$0]  %s18_s20, 2560, %s20_s22, [#allocation3], %s467_s26, %s467_s26, %s468_s27  }
   0x6   :  { %s469_s28 = smov [#allocation5]  }
   0x7   :  { %s37_s29 = sshll.u32 %s469_s28, 4  ;;  %s38_s29 = int_to_ptr.vmem [resolvable:$true] %s37_s29 }
   0x8   :  { %40 = dma.hbm_to_vmem [thread:$0]  %s36_s25, 128, %s38_s29, [#allocation6]  }
   0x9   :  { %460 = dma.done.wait [#allocation3], 2560  }
   0xa   :  { %461 = vsyncadd [#allocation3], 4294964736 }
   0xb   :  { %462 = dma.done.wait [#allocation6], 128  }
   0xc   :  { %463 = vsyncadd [#allocation6], 4294967168  ;;  %v470_v0 = vmov 0   ;;  %vm82_vm0 = vcmask 1043456   ;;  %v70_v1 = vld [vmem:[#allocation2 + $0x90] sm:$0xf]  ;;  %v183_v23 = vlaneseq }
   0xd   :  { %382 = vset.pattern.permute.xlu0 %v470_v0  ;;  %v71_v2 = vld [vmem:[#allocation2 + $0x98] sm:$0xf]  ;;  %v66_v3 = vld [vmem:[#allocation2 + $0x70] sm:$0xff]  ;;  %366 = vmatpush.msk.msra.mxu2 %vm82_vm0, %v70_v1  ;;  %v68_v7 = vld [vmem:[#allocation2 + $0x80] sm:$0xf]  ;;  %vm78_vm1 = vcmask 293888  }
   0xe   :  { %368 = vmatpush.msk.msra.mxu3 %vm82_vm0, %v71_v2  ;;  %v67_v4 = vld [vmem:[#allocation2 + $0x78] sm:$0xff]  ;;  %v62_v5 = vld [vmem:[#allocation2 + $0x50] sm:$0xff]  ;;  %v69_v8 = vld [vmem:[#allocation2 + $0x88] sm:$0xf]  ;;  %362 = vmatpush.msk.msra.mxu0 %vm82_vm0, %v68_v7  ;;  %v189_v24 = vshrl.u32 %v183_v23, 7  ;;  %v184_v25 = vand.u32 127, %v183_v23 }
   0xf   :  { %v63_v6 = vld [vmem:[#allocation2 + $0x58] sm:$0xff]  ;;  %147 = vmatpush.msra.mxu2 %v66_v3  ;;  %v64_v9 = vld [vmem:[#allocation2 + $0x60] sm:$0xff]  ;;  %v65_v10 = vld [vmem:[#allocation2 + $0x68] sm:$0xff]  ;;  %364 = vmatpush.msk.msra.mxu1 %vm82_vm0, %v69_v8  ;;  %v471_v49 = vmov 0.00390625   ;;  %vm294_vm14 = vcmask 64512   ;;  %vm318_vm15 = vcmask 1041408  }
  0x10   :  { %167 = vmatpush.msra.mxu3 %v67_v4  ;;  %v58_v11 = vld [vmem:[#allocation2 + $0x30] sm:$0xff]  ;;  %v59_v12 = vld [vmem:[#allocation2 + $0x38] sm:$0xff]  ;;  %v60_v13 = vld [vmem:[#allocation2 + $0x40] sm:$0xff]  ;;  %107 = vmatpush.msra.mxu0 %v64_v9  ;;  %v195_v26 = vadd.s32 1, %v189_v24  ;;  %v186_v30 = vadd.s32 256, %v184_v25  ;;  %v190_v31 = vmul.u32 256, %v189_v24 }
  0x11   :  { %148 = vmatpush.msra.mxu2 %v62_v5  ;;  %v61_v14 = vld [vmem:[#allocation2 + $0x48] sm:$0xff]  ;;  %127 = vmatpush.msra.mxu1 %v65_v10  ;;  %v54_v15 = vld [vmem:[#allocation2 + $0x10] sm:$0xff]  ;;  %v55_v16 = vld [vmem:[#allocation2 + $0x18] sm:$0xff]  ;;  %v185_v33 = vadd.s32 128, %v184_v25  ;;  %v187_v38 = vadd.s32 384, %v184_v25  ;;  %s351_s10 = sshll.u32 %s538_s5, 4  ;;  %s352_s10 = int_to_ptr.hbm [resolvable:$true] %s351_s10 }
  0x12   :  { %168 = vmatpush.msra.mxu3 %v63_v6  ;;  %v51_v17 = vld [vmem:[%s534_s1] sm:$0xff]  ;;  %108 = vmatpush.msra.mxu0 %v60_v13  ;;  %v57_v19 = vld [vmem:[#allocation2 + $0x28] sm:$0xff]  ;;  %v196_v32 = vmul.u32 256, %v195_v26  ;;  %vm191_vm2 = vcmp.ge.s32.totalorder %v184_v25, %v190_v31  ;;  %vm193_vm4 = vcmp.ge.s32.totalorder %v186_v30, %v190_v31 }
  0x13   :  { %149 = vmatpush.msra.mxu2 %v58_v11  ;;  %128 = vmatpush.msra.mxu1 %v61_v14  ;;  %v56_v18 = vld [vmem:[#allocation2 + $0x20] sm:$0xff]  ;;  %v53_v22 = vld [vmem:[#allocation2 + $0x8] sm:$0xff]  ;;  %vm192_vm6 = vcmp.ge.s32.totalorder %v185_v33, %v190_v31  ;;  %vm194_vm8 = vcmp.ge.s32.totalorder %v187_v38, %v190_v31 }
  0x14   :  { %169 = vmatpush.msra.mxu3 %v59_v12  ;;  %v72_v20 = vld [vmem:[%s535_s2] sm:$0xff]  ;;  %109 = vmatpush.msra.mxu0 %v56_v18  ;;  %vm197_vm3 = vcmp.lt.s32.totalorder %v184_v25, %v196_v32  ;;  %vm199_vm5 = vcmp.lt.s32.totalorder %v186_v30, %v196_v32  ;;  %vm198_vm7 = vcmp.lt.s32.totalorder %v185_v33, %v196_v32 }
  0x15   :  { %150 = vmatpush.msra.mxu2 %v54_v15  ;;  %v52_v21 = vld [vmem:[#allocation2] sm:$0xff]  ;;  %129 = vmatpush.msra.mxu1 %v57_v19  ;;  %vm200_vm9 = vcmp.lt.s32.totalorder %v187_v38, %v196_v32  ;;  %vm201_vm10 = vmand %vm191_vm2, %vm197_vm3 }
  0x16   :  { %170 = vmatpush.msra.mxu3 %v55_v16  ;;  %367 = vmatmul.msk.f32.vlgmr.msra.gmra.mxu2 %vm78_vm1, %v51_v17  ;;  %vm202_vm11 = vmand %vm192_vm6, %vm198_vm7  ;;  %v289_v50 = vld [vmem:[#allocation5] sm:$0xff] }
  0x17   :  { %369 = vmatmul.msk.f32.vlgmr.msra.gmra.mxu3 %vm78_vm1, %v51_v17  ;;  %75 = vperm.xlu0 %382, %v72_v20   ;;  %vm203_vm12 = vmand %vm193_vm4, %vm199_vm5  ;;  %v383_v58 = vld [vmem:[%s537_s4] ss:$0 sm:$0xff]  ;;  %s472_s4 = smov [#allocation7]  }
  0x18   :  { %110 = vmatpush.msra.mxu0 %v52_v21  ;;  %130 = vmatpush.msra.mxu1 %v53_v22  ;;  %vm204_vm13 = vmand %vm194_vm8, %vm200_vm9  ;;  %s349_s7 = sshll.u32 %s472_s4, 4  ;;  %s350_s7 = int_to_ptr.vmem [resolvable:$true] %s349_s7 }
  0x19   :  { %363 = vmatmul.msk.f32.vlgmr.msra.gmra.mxu0 %vm78_vm1, %v51_v17  ;;  %365 = vmatmul.msk.f32.vlgmr.msra.gmra.mxu1 %vm78_vm1, %v51_v17 }
  0x89   :  { %v76_v27 = vpop.permute.xlu0 %75 }
  0x96   :  { %v112_v28 = vpop.f32.mrf.mxu0  ;;  %v132_v29 = vpop.f32.mrf.mxu1 }
  0x97   :  { %v113_v34 = vadd.f32 %v112_v28, %v76_v27  ;;  %v133_v35 = vadd.f32 %v132_v29, %v76_v27 }
  0x99   :  { %v152_v36 = vpop.f32.mrf.mxu2  ;;  %v175_v39 = vmax.f32 %v113_v34, 0.0  ;;  %v176_v40 = vmax.f32 %v133_v35, 0.0 }
  0x9a   :  { %v172_v37 = vpop.f32.mrf.mxu3  ;;  %v153_v41 = vadd.f32 %v152_v36, %v76_v27 }
  0x9b   :  { %v173_v42 = vadd.f32 %v172_v37, %v76_v27  ;;  %v179_v45 = vmin.f32 %v175_v39, 6.0  ;;  %v180_v46 = vmin.f32 %v176_v40, 6.0 }
  0x9c   :  { %v177_v43 = vmax.f32 %v153_v41, 0.0 }
  0x9d   :  { %v178_v44 = vmax.f32 %v173_v42, 0.0  ;;  %224 = vmatpush.xpose.msrb.mxu0 %v179_v45  ;;  %244 = vmatpush.xpose.msrb.mxu1 %v180_v46 }
  0x9e   :  { %v181_v47 = vmin.f32 %v177_v43, 6.0 }
  0x9f   :  { %v182_v48 = vmin.f32 %v178_v44, 6.0 }
  0xa0   :  { %264 = vmatpush.xpose.msrb.mxu2 %v181_v47  ;;  %370 = vmatmul.msk.f32.vlgmr.msrb.gmra.mxu0 %vm201_vm10, %v471_v49 }
  0xa1   :  { %284 = vmatpush.xpose.msrb.mxu3 %v182_v48  ;;  %371 = vmatmul.msk.f32.vlgmr.msrb.gmra.mxu1 %vm202_vm11, %v471_v49 }
  0xa2   :  { %313 = vmatpush.msra.mxu0 %v289_v50 }
  0xa3   :  { %372 = vmatmul.msk.f32.vlgmr.msrb.gmra.mxu2 %vm203_vm12, %v471_v49 }
  0xa4   :  { %373 = vmatmul.msk.f32.vlgmr.msrb.gmra.mxu3 %vm204_vm13, %v471_v49 }
 0x11d   :  { %v226_v51 = vpop.f32.mrf.mxu0 }
 0x11e   :  { %v246_v52 = vpop.f32.mrf.mxu1 }
 0x11f   :  { %v247_v53 = vadd.f32 %v246_v52, %v226_v51 }
 0x126   :  { %v266_v54 = vpop.f32.mrf.mxu2 }
 0x127   :  { %v286_v55 = vpop.f32.mrf.mxu3  ;;  %v267_v56 = vadd.f32 %v266_v54, %v247_v53 }
 0x129   :  { %v287_v57 = vadd.f32 %v286_v55, %v267_v56 }
 0x12b   :  { %374 = vmatmul.msk.f32.vlgmr.msra.gmra.mxu0 %vm294_vm14, %v287_v57 }
 0x1a8   :  { %v315_v59 = vpop.f32.mrf.mxu0 }
 0x1a9   :  { %v316_v60 = vadd.f32 %v383_v58, %v315_v59 }
 0x1ab   :  { %v319_v61 = vsel %vm318_vm15, %v316_v60, -inf }
 0x1ac   :  { %320 = vmax.xlane.f32.xlu0 %v319_v61 }
 0x21f   :  { %v321_v62 = vpop.xlane.xlu0 %320 }
 0x220   :  { %v322_v63 = vsub.f32 %v316_v60, %v321_v62 }
 0x222   :  { %v323_v0 = vmul.f32 1.442695, %v322_v63 }
 0x224   :  { %384 = vpow2.f32 %v323_v0 }
 0x22a   :  { %v385_v1 = vpop.eup %384 }
 0x22b   :  { %v325_v2 = vsel %vm318_vm15, %v385_v1, 0.0 }
 0x22c   :  { %326 = vadd.xlane.f32.xlu1 %v325_v2 }
 0x29f   :  { %v327_v3 = vpop.xlane.xlu1 %326 }
 0x2a0   :  { %386 = vrcp.f32 %v327_v3  ;;  %v339_v7 = vand.u32 2147483648, %v327_v3  ;;  %v337_v9 = vand.u32 2147483647, %v327_v3  ;;  %vm333_vm1 = vweird.f32 %v327_v3 }
 0x2a2   :  { %v340_v11 = vor.u32 1.1754944e-38, %v339_v7  ;;  %vm338_vm3 = vcmp.eq.f32.partialorder %v337_v9, 8.507059e+37 }
 0x2a6   :  { %v387_v4 = vpop.eup %386 }
 0x2a7   :  { %v329_v5 = vmul.f32 %v387_v4, %v327_v3  ;;  %vm334_vm0 = vweird.f32 %v387_v4 }
 0x2a8   :  { %vm335_vm2 = vmor %vm333_vm1, %vm334_vm0 }
 0x2a9   :  { %v330_v6 = vsub.f32 1.0, %v329_v5 }
 0x2ab   :  { %v331_v8 = vmul.f32 %v387_v4, %v330_v6 }
 0x2ad   :  { %v332_v10 = vadd.f32 %v387_v4, %v331_v8 }
 0x2af   :  { %v336_v12 = vsel %vm335_vm2, %v387_v4, %v332_v10 }
 0x2b0   :  { %v341_v13 = vsel %vm338_vm3, %v340_v11, %v336_v12 }
 0x2b1   :  { %v342_v14 = vmul.f32 %v385_v1, %v341_v13 }
 0x2b3   :  { %343 = vst [vmem:[#allocation7] sm:$0x3] %v342_v14 }
 0x2b4   :  { %354 = dma.vmem_to_hbm [thread:$0]  %s350_s7, 32, %s352_s10, [#allocation4]  }
 0x2b5   :  { %464 = dma.done.wait [#allocation4], 32  }
 0x2b6   :  { %465 = vsyncadd [#allocation4], 4294967264 }
 0x2b7   :  { %359 = vsyncpa [#allocation3], 1 }
 0x2b8   :  { %360 = vsyncpa [#allocation6], 1 }
 0x2b9   :  { %361 = vsyncpa [#allocation4], 1 }

</bundles_post_ra>
